<compile_context>
chip_gen: v7x
topology: tpu7x:2x2x1
jax: 0.10.0
libtpu: 0.0.40
codegen_flags: <defaults>
</compile_context>

<pallas_src>
import functools

import jax
import jax.numpy as jnp
from jax.experimental import pallas as pl
from jax.experimental.pallas import tpu as pltpu


def _round_up(n, m):
    return ((n + m - 1) // m) * m


# ----------------------------------------------------------------------------
# Fused kernel: 3 activation blocks, 3 W1 tiles, stacked W2, packed biases,
# one concatenated output.  relu(x @ W1 + b1) @ W2 + b2, f32 MXU accumulation.
# ----------------------------------------------------------------------------
def _tri_modal_kernel(xt_ref, xi_ref, xp_ref,
                      wt1_ref, wi1_ref, wp1_ref,
                      w2_ref, bias_ref, out_ref):
    h_pad = wt1_ref.shape[1]
    e_pad = w2_ref.shape[2]

    bias = bias_ref[...]                       # (8, bias_cols) f32, rows 0..5 used
    bt1, bt2 = bias[0:1, :h_pad], bias[1:2, :e_pad]
    bi1, bi2 = bias[2:3, :h_pad], bias[3:4, :e_pad]
    bp1, bp2 = bias[4:5, :h_pad], bias[5:6, :e_pad]

    def mlp(x, w1, b1, w2, b2):
        # bf16 MXU matmuls with f32 accumulation; bias-add / ReLU on the f32
        # accumulator, downcast only for the second MXU pass.
        h = jnp.dot(x, w1, preferred_element_type=jnp.float32) + b1
        h = jnp.maximum(h, 0.0).astype(w2.dtype)
        return jnp.dot(h, w2, preferred_element_type=jnp.float32) + b2

    # Text: mean-pool over the sequence axis in-kernel (sublane reduce on the
    # VPU) so W1_text keeps its true (D_text, H) size.
    xt = jnp.mean(xt_ref[...].astype(jnp.float32), axis=1).astype(wt1_ref.dtype)
    ot = mlp(xt,          wt1_ref[...], bt1, w2_ref[0], bt2)
    oi = mlp(xi_ref[...], wi1_ref[...], bi1, w2_ref[1], bi2)
    op = mlp(xp_ref[...], wp1_ref[...], bp1, w2_ref[2], bp2)

    # Single wide, lane-dense store -> one output DMA per grid step.
    out_ref[...] = jnp.concatenate([ot, oi, op], axis=-1).astype(out_ref.dtype)


# ----------------------------------------------------------------------------
# Parameter construction (PyTorch-Linear-style uniform init) + one-time
# preparation (lane padding of N dims only, bf16 cast, W2 stack, bias pack).
# ----------------------------------------------------------------------------
def _init_linear(key, d_in, d_out):
    kw, kb = jax.random.split(key)
    bound = 1.0 / jnp.sqrt(jnp.float32(d_in))
    w = jax.random.uniform(kw, (d_in, d_out), jnp.float32, -bound, bound)
    b = jax.random.uniform(kb, (1, d_out), jnp.float32, -bound, bound)
    return w, b


def init_tri_modal_params(key, d_text, d_imu_flat, d_pose_flat, hidden, d_embed):
    keys = jax.random.split(key, 6)
    return {
        "text": (*_init_linear(keys[0], d_text, hidden),
                 *_init_linear(keys[1], hidden, d_embed)),
        "imu": (*_init_linear(keys[2], d_imu_flat, hidden),
                *_init_linear(keys[3], hidden, d_embed)),
        "pose": (*_init_linear(keys[4], d_pose_flat, hidden),
                 *_init_linear(keys[5], hidden, d_embed)),
    }


def prepare_params(params, *, compute_dtype=jnp.bfloat16):
    tw1, tb1, tw2, tb2 = params["text"]
    iw1, ib1, iw2, ib2 = params["imu"]
    pw1, pb1, pw2, pb2 = params["pose"]

    hidden, d_embed = tw2.shape
    h_pad = _round_up(hidden, 128)
    e_pad = _round_up(d_embed, 128)

    def pad_cols(a, cols):
        return jnp.pad(a, ((0, 0), (0, cols - a.shape[1])))

    # W1: contract (K) dim stays at its true size; only the hidden dim padded.
    wt1 = pad_cols(tw1, h_pad).astype(compute_dtype)
    wi1 = pad_cols(iw1, h_pad).astype(compute_dtype)
    wp1 = pad_cols(pw1, h_pad).astype(compute_dtype)

    # W2: same shape for all encoders -> one stacked (3, h_pad, e_pad) tile.
    def pad_w2(w):
        return jnp.pad(w, ((0, h_pad - w.shape[0]), (0, e_pad - w.shape[1])))
    w2 = jnp.stack([pad_w2(tw2), pad_w2(iw2), pad_w2(pw2)]).astype(compute_dtype)

    # Biases: rows 0..5 of one (8, bias_cols) f32 buffer (bias-add happens on
    # the f32 accumulator, so biases stay f32).
    bias_cols = max(h_pad, e_pad)
    rows = [pad_cols(b, bias_cols) for b in (tb1, tb2, ib1, ib2, pb1, pb2)]
    rows.append(jnp.zeros((2, bias_cols), jnp.float32))
    bias = jnp.concatenate(rows, axis=0)

    return {"wt1": wt1, "wi1": wi1, "wp1": wp1, "w2": w2, "bias": bias}


# ----------------------------------------------------------------------------
# Forward: one fused pallas_call, adaptive batch tiling, outputs split back to
# three logical (B, D_EMBED) arrays in the wrapper.
# ----------------------------------------------------------------------------
def _pick_batch_tile(B):
    """Largest batch tile whose zero-row padding waste stays small."""
    for tb in (256, 128, 64, 32, 16, 8):
        if _round_up(B, tb) - B <= max(8, B // 16):
            return tb
    return 8


@functools.partial(jax.jit, static_argnames=("d_embed",))
def tri_modal_forward(prepared, text_input, imu_input, pose_input, *, d_embed):
    wt1, wi1, wp1 = prepared["wt1"], prepared["wi1"], prepared["wp1"]
    w2, bias = prepared["w2"], prepared["bias"]
    cdt = wt1.dtype
    h_pad = wt1.shape[1]
    e_pad = w2.shape[2]

    B, T, d_text = text_input.shape
    k_imu = imu_input.shape[1] * imu_input.shape[2]
    k_pose = pose_input.shape[1] * pose_input.shape[2]

    # Activations in the bf16 compute dtype (half the HBM->VMEM bytes).  The
    # contract dims are NOT padded in HBM; only batch rows are padded, and
    # only when more than one batch tile is needed.
    xt = text_input.astype(cdt)                        # (B, T, d_text)
    xi = imu_input.reshape(B, k_imu).astype(cdt)       # (B, k_imu)
    xp = pose_input.reshape(B, k_pose).astype(cdt)     # (B, k_pose)

    if B <= 256:
        TB, Bp = B, B                                  # single un-padded tile
    else:
        TB = _pick_batch_tile(B)
        Bp = _round_up(B, TB)
    if Bp != B:
        xt = jnp.pad(xt, ((0, Bp - B), (0, 0), (0, 0)))
        xi = jnp.pad(xi, ((0, Bp - B), (0, 0)))
        xp = jnp.pad(xp, ((0, Bp - B), (0, 0)))

    n_tiles = Bp // TB
    grid = (n_tiles,)

    # Weights / biases: constant index_map (resident across batch tiles) and
    # single-buffered -- double-buffering never-refetched operands only wastes
    # VMEM (matters most under v7x's 64 MiB).
    def w_spec(a):
        nd = a.ndim
        return pl.BlockSpec(tuple(a.shape), lambda *_: (0,) * nd,
                            pipeline_mode=pl.Buffered(1))

    in_specs = [
        pl.BlockSpec((TB, T, d_text), lambda i: (i, 0, 0)),
        pl.BlockSpec((TB, k_imu), lambda i: (i, 0)),
        pl.BlockSpec((TB, k_pose), lambda i: (i, 0)),
        w_spec(wt1), w_spec(wi1), w_spec(wp1), w_spec(w2), w_spec(bias),
    ]
    out_specs = pl.BlockSpec((TB, 3 * e_pad), lambda i: (i, 0))
    out_shape = jax.ShapeDtypeStruct((Bp, 3 * e_pad), jnp.float32)

    # v7x: CORE_PARALLEL shards batch tiles across the two TensorCores; fall
    # back to plain "parallel" for single-tile grids / older jax.
    core_parallel = getattr(pltpu, "CORE_PARALLEL", None)
    batch_sem = (core_parallel
                 if (n_tiles > 1 and core_parallel is not None) else "parallel")

    # Explicit VMEM budget: 2x double-buffered activation tiles + 2x output
    # tiles + 1x resident weights/biases, plus headroom; capped under v7x's
    # 64 MiB physical ceiling.
    act_itemsize = jnp.dtype(cdt).itemsize
    isz = lambda a: int(a.size) * a.dtype.itemsize
    act_tile = TB * (T * d_text + k_imu + k_pose) * act_itemsize
    out_tile = TB * 3 * e_pad * 4
    w_bytes = isz(wt1) + isz(wi1) + isz(wp1) + isz(w2) + isz(bias)
    vmem_est = 2 * act_tile + 2 * out_tile + w_bytes
    vmem_limit = int(min(max(2 * vmem_est + (4 << 20), 8 << 20), 64 << 20))

    out = pl.pallas_call(
        _tri_modal_kernel,
        grid=grid,
        in_specs=in_specs,
        out_specs=out_specs,
        out_shape=out_shape,
        compiler_params=pltpu.CompilerParams(
            dimension_semantics=(batch_sem,),
            vmem_limit_bytes=vmem_limit),
    )(xt, xi, xp, wt1, wi1, wp1, w2, bias)

    # Strip batch padding and split the concatenated lane-dense output.
    text_out = out[:B, 0:d_embed]
    imu_out = out[:B, e_pad:e_pad + d_embed]
    pose_out = out[:B, 2 * e_pad:2 * e_pad + d_embed]
    return text_out, imu_out, pose_out


# ----------------------------------------------------------------------------
# Main
# ----------------------------------------------------------------------------
if __name__ == "__main__":
    key = jax.random.PRNGKey(0)
    k_text, k_imu, k_pose, k_params = jax.random.split(key, 4)

    # small shapes
    B = 2
    T, D_TEXT = 8, 32        # text: (B, T, D_text)
    S, C_IMU = 8, 6          # imu:  (B, S, C_imu)
    J = 17                   # pose: (B, J, 3)
    HIDDEN = 64
    D_EMBED = 16

    text_input = jax.random.normal(k_text, (B, T, D_TEXT), jnp.float32)
    imu_input = jax.random.normal(k_imu, (B, S, C_IMU), jnp.float32)
    pose_input = jax.random.normal(k_pose, (B, J, 3), jnp.float32)

    raw_params = init_tri_modal_params(
        k_params, d_text=D_TEXT, d_imu_flat=S * C_IMU,
        d_pose_flat=J * 3, hidden=HIDDEN, d_embed=D_EMBED)
    prepared = prepare_params(raw_params)

    text_out, imu_out, pose_out = tri_modal_forward(
        prepared, text_input, imu_input, pose_input, d_embed=D_EMBED)
    jax.block_until_ready((text_out, imu_out, pose_out))

    # Pure-JAX reference using the same bf16 weight/activation quantization and
    # f32 accumulation recipe as the kernel.
    cdt = jnp.bfloat16

    def ref_mlp(x, w1, b1, w2, b2):
        h = jnp.dot(x.astype(cdt), w1.astype(cdt),
                    preferred_element_type=jnp.float32) + b1
        h = jnp.maximum(h, 0.0)
        return jnp.dot(h.astype(cdt), w2.astype(cdt),
                       preferred_element_type=jnp.float32) + b2

    ref_text = ref_mlp(
        jnp.mean(text_input.astype(cdt).astype(jnp.float32), axis=1),
        *raw_params["text"])
    ref_imu = ref_mlp(imu_input.reshape(B, -1), *raw_params["imu"])
    ref_pose = ref_mlp(pose_input.reshape(B, -1), *raw_params["pose"])

    assert text_out.shape == (B, D_EMBED)
    assert imu_out.shape == (B, D_EMBED)
    assert pose_out.shape == (B, D_EMBED)
    assert jnp.allclose(text_out, ref_text, atol=2e-2, rtol=2e-2)
    assert jnp.allclose(imu_out, ref_imu, atol=2e-2, rtol=2e-2)
    assert jnp.allclose(pose_out, ref_pose, atol=2e-2, rtol=2e-2)

    print("KERNEL_OK")
</pallas_src>

<mosaic_0001>
module attributes {stable_mosaic.version = 11 : i64} {
  func.func @_tri_modal_kernel(%arg0: i32, %arg1: memref<2x8x32xbf16, #tpu.memory_space<vmem>>, %arg2: memref<2x48xbf16, #tpu.memory_space<vmem>>, %arg3: memref<2x51xbf16, #tpu.memory_space<vmem>>, %arg4: memref<32x128xbf16, #tpu.memory_space<vmem>>, %arg5: memref<48x128xbf16, #tpu.memory_space<vmem>>, %arg6: memref<51x128xbf16, #tpu.memory_space<vmem>>, %arg7: memref<3x128x128xbf16, #tpu.memory_space<vmem>>, %arg8: memref<8x128xf32, #tpu.memory_space<vmem>>, %arg9: memref<2x384xf32, #tpu.memory_space<vmem>>) attributes {dimension_semantics = [#tpu.dimension_semantics<parallel>], iteration_bounds = array<i64: 1>, scalar_prefetch = 0 : i64, scratch_operands = 0 : i64, tpu.core_type = #tpu.core_type<tc>, window_params = [{transform_indices = @transform_0, window_bounds = array<i64: 2, 8, 32>}, {transform_indices = @transform_1, window_bounds = array<i64: 2, 48>}, {transform_indices = @transform_2, window_bounds = array<i64: 2, 51>}, {pipeline_mode = #tpu.pipeline_mode<synchronous>, transform_indices = @transform_3, window_bounds = array<i64: 32, 128>}, {pipeline_mode = #tpu.pipeline_mode<synchronous>, transform_indices = @transform_4, window_bounds = array<i64: 48, 128>}, {pipeline_mode = #tpu.pipeline_mode<synchronous>, transform_indices = @transform_5, window_bounds = array<i64: 51, 128>}, {pipeline_mode = #tpu.pipeline_mode<synchronous>, transform_indices = @transform_6, window_bounds = array<i64: 3, 128, 128>}, {pipeline_mode = #tpu.pipeline_mode<synchronous>, transform_indices = @transform_7, window_bounds = array<i64: 8, 128>}, {transform_indices = @transform_8, window_bounds = array<i64: 2, 384>}]} {
    %c0 = arith.constant 0 : index
    %c0_0 = arith.constant 0 : index
    %0 = vector.load %arg8[%c0, %c0_0] : memref<8x128xf32, #tpu.memory_space<vmem>>, vector<8x128xf32>
    %1 = vector.extract_strided_slice %0 {offsets = [0, 0], sizes = [1, 128], strides = [1, 1]} : vector<8x128xf32> to vector<1x128xf32>
    %2 = vector.extract_strided_slice %0 {offsets = [1, 0], sizes = [1, 128], strides = [1, 1]} : vector<8x128xf32> to vector<1x128xf32>
    %3 = vector.extract_strided_slice %0 {offsets = [2, 0], sizes = [1, 128], strides = [1, 1]} : vector<8x128xf32> to vector<1x128xf32>
    %4 = vector.extract_strided_slice %0 {offsets = [3, 0], sizes = [1, 128], strides = [1, 1]} : vector<8x128xf32> to vector<1x128xf32>
    %5 = vector.extract_strided_slice %0 {offsets = [4, 0], sizes = [1, 128], strides = [1, 1]} : vector<8x128xf32> to vector<1x128xf32>
    %6 = vector.extract_strided_slice %0 {offsets = [5, 0], sizes = [1, 128], strides = [1, 1]} : vector<8x128xf32> to vector<1x128xf32>
    %c0_1 = arith.constant 0 : index
    %c0_2 = arith.constant 0 : index
    %c0_3 = arith.constant 0 : index
    %7 = vector.load %arg1[%c0_1, %c0_2, %c0_3] : memref<2x8x32xbf16, #tpu.memory_space<vmem>>, vector<2x8x32xbf16>
    %8 = arith.extf %7 : vector<2x8x32xbf16> to vector<2x8x32xf32>
    %cst = arith.constant dense<0.000000e+00> : vector<2x32xf32>
    %9 = vector.multi_reduction <add>, %8, %cst [1] : vector<2x8x32xf32> to vector<2x32xf32>
    %cst_4 = arith.constant 8.000000e+00 : f32
    %10 = vector.broadcast %cst_4 : f32 to vector<2x32xf32>
    %11 = arith.divf %9, %10 : vector<2x32xf32>
    %12 = arith.truncf %11 : vector<2x32xf32> to vector<2x32xbf16>
    %c0_5 = arith.constant 0 : index
    %c0_6 = arith.constant 0 : index
    %13 = vector.load %arg4[%c0_5, %c0_6] : memref<32x128xbf16, #tpu.memory_space<vmem>>, vector<32x128xbf16>
    %c0_7 = arith.constant 0 : index
    %c0_8 = arith.constant 0 : index
    %c0_9 = arith.constant 0 : index
    %14 = vector.load %arg7[%c0_7, %c0_8, %c0_9] : memref<3x128x128xbf16, #tpu.memory_space<vmem>>, vector<1x128x128xbf16>
    %15 = vector.shape_cast %14 : vector<1x128x128xbf16> to vector<128x128xbf16>
    %cst_10 = arith.constant dense<0.000000e+00> : vector<2x128xf32>
    %16 = tpu.matmul %12, %13, %cst_10 {dimension_numbers = #tpu.dot_dimension_numbers<[1], [0], [0], [1], [0, 0, 1, 1], [], []>} : vector<2x32xbf16>, vector<32x128xbf16>, vector<2x128xf32> -> vector<2x128xf32>
    %17 = vector.broadcast %1 : vector<1x128xf32> to vector<2x128xf32>
    %18 = arith.addf %16, %17 : vector<2x128xf32>
    %cst_11 = arith.constant 0.000000e+00 : f32
    %19 = vector.broadcast %cst_11 : f32 to vector<2x128xf32>
    %20 = arith.maximumf %18, %19 : vector<2x128xf32>
    %21 = arith.truncf %20 : vector<2x128xf32> to vector<2x128xbf16>
    %cst_12 = arith.constant dense<0.000000e+00> : vector<2x128xf32>
    %22 = tpu.matmul %21, %15, %cst_12 {dimension_numbers = #tpu.dot_dimension_numbers<[1], [0], [0], [1], [0, 0, 1, 1], [], []>} : vector<2x128xbf16>, vector<128x128xbf16>, vector<2x128xf32> -> vector<2x128xf32>
    %23 = vector.broadcast %2 : vector<1x128xf32> to vector<2x128xf32>
    %24 = arith.addf %22, %23 : vector<2x128xf32>
    %c0_13 = arith.constant 0 : index
    %c0_14 = arith.constant 0 : index
    %25 = vector.load %arg2[%c0_13, %c0_14] : memref<2x48xbf16, #tpu.memory_space<vmem>>, vector<2x48xbf16>
    %c0_15 = arith.constant 0 : index
    %c0_16 = arith.constant 0 : index
    %26 = vector.load %arg5[%c0_15, %c0_16] : memref<48x128xbf16, #tpu.memory_space<vmem>>, vector<48x128xbf16>
    %c1 = arith.constant 1 : index
    %c0_17 = arith.constant 0 : index
    %c0_18 = arith.constant 0 : index
    %27 = vector.load %arg7[%c1, %c0_17, %c0_18] : memref<3x128x128xbf16, #tpu.memory_space<vmem>>, vector<1x128x128xbf16>
    %28 = vector.shape_cast %27 : vector<1x128x128xbf16> to vector<128x128xbf16>
    %cst_19 = arith.constant dense<0.000000e+00> : vector<2x128xf32>
    %29 = tpu.matmul %25, %26, %cst_19 {dimension_numbers = #tpu.dot_dimension_numbers<[1], [0], [0], [1], [0, 0, 1, 1], [], []>} : vector<2x48xbf16>, vector<48x128xbf16>, vector<2x128xf32> -> vector<2x128xf32>
    %30 = vector.broadcast %3 : vector<1x128xf32> to vector<2x128xf32>
    %31 = arith.addf %29, %30 : vector<2x128xf32>
    %cst_20 = arith.constant 0.000000e+00 : f32
    %32 = vector.broadcast %cst_20 : f32 to vector<2x128xf32>
    %33 = arith.maximumf %31, %32 : vector<2x128xf32>
    %34 = arith.truncf %33 : vector<2x128xf32> to vector<2x128xbf16>
    %cst_21 = arith.constant dense<0.000000e+00> : vector<2x128xf32>
    %35 = tpu.matmul %34, %28, %cst_21 {dimension_numbers = #tpu.dot_dimension_numbers<[1], [0], [0], [1], [0, 0, 1, 1], [], []>} : vector<2x128xbf16>, vector<128x128xbf16>, vector<2x128xf32> -> vector<2x128xf32>
    %36 = vector.broadcast %4 : vector<1x128xf32> to vector<2x128xf32>
    %37 = arith.addf %35, %36 : vector<2x128xf32>
    %c0_22 = arith.constant 0 : index
    %c0_23 = arith.constant 0 : index
    %38 = vector.load %arg3[%c0_22, %c0_23] : memref<2x51xbf16, #tpu.memory_space<vmem>>, vector<2x51xbf16>
    %c0_24 = arith.constant 0 : index
    %c0_25 = arith.constant 0 : index
    %39 = vector.load %arg6[%c0_24, %c0_25] : memref<51x128xbf16, #tpu.memory_space<vmem>>, vector<51x128xbf16>
    %c2 = arith.constant 2 : index
    %c0_26 = arith.constant 0 : index
    %c0_27 = arith.constant 0 : index
    %40 = vector.load %arg7[%c2, %c0_26, %c0_27] : memref<3x128x128xbf16, #tpu.memory_space<vmem>>, vector<1x128x128xbf16>
    %41 = vector.shape_cast %40 : vector<1x128x128xbf16> to vector<128x128xbf16>
    %cst_28 = arith.constant dense<0.000000e+00> : vector<2x128xf32>
    %42 = tpu.matmul %38, %39, %cst_28 {dimension_numbers = #tpu.dot_dimension_numbers<[1], [0], [0], [1], [0, 0, 1, 1], [], []>} : vector<2x51xbf16>, vector<51x128xbf16>, vector<2x128xf32> -> vector<2x128xf32>
    %43 = vector.broadcast %5 : vector<1x128xf32> to vector<2x128xf32>
    %44 = arith.addf %42, %43 : vector<2x128xf32>
    %cst_29 = arith.constant 0.000000e+00 : f32
    %45 = vector.broadcast %cst_29 : f32 to vector<2x128xf32>
    %46 = arith.maximumf %44, %45 : vector<2x128xf32>
    %47 = arith.truncf %46 : vector<2x128xf32> to vector<2x128xbf16>
    %cst_30 = arith.constant dense<0.000000e+00> : vector<2x128xf32>
    %48 = tpu.matmul %47, %41, %cst_30 {dimension_numbers = #tpu.dot_dimension_numbers<[1], [0], [0], [1], [0, 0, 1, 1], [], []>} : vector<2x128xbf16>, vector<128x128xbf16>, vector<2x128xf32> -> vector<2x128xf32>
    %49 = vector.broadcast %6 : vector<1x128xf32> to vector<2x128xf32>
    %50 = arith.addf %48, %49 : vector<2x128xf32>
    %51 = tpu.concatenate %24, %37, %50 in 1 : vector<2x128xf32>, vector<2x128xf32>, vector<2x128xf32> -> vector<2x384xf32>
    %c0_31 = arith.constant 0 : index
    %c0_32 = arith.constant 0 : index
    %52 = vector.load %arg9[%c0_31, %c0_32] : memref<2x384xf32, #tpu.memory_space<vmem>>, vector<2x384xf32>
    tpu.vector_store %arg9[%c0_31, %c0_32], %51 {strides = array<i32>} : memref<2x384xf32, #tpu.memory_space<vmem>>, vector<2x384xf32>,
    return
  }
  func.func @transform_0(%arg0: i32) -> (i32, i32, i32) {
    %c0_i32 = arith.constant 0 : i32
    %c0_i32_0 = arith.constant 0 : i32
    %c0_i32_1 = arith.constant 0 : i32
    return %arg0, %c0_i32, %c0_i32_0 : i32, i32, i32
  }
  func.func @transform_1(%arg0: i32) -> (i32, i32) {
    %c0_i32 = arith.constant 0 : i32
    %c0_i32_0 = arith.constant 0 : i32
    return %arg0, %c0_i32 : i32, i32
  }
  func.func @transform_2(%arg0: i32) -> (i32, i32) {
    %c0_i32 = arith.constant 0 : i32
    %c0_i32_0 = arith.constant 0 : i32
    return %arg0, %c0_i32 : i32, i32
  }
  func.func @transform_3(%arg0: i32) -> (i32, i32) {
    %c0_i32 = arith.constant 0 : i32
    %c0_i32_0 = arith.constant 0 : i32
    %c0_i32_1 = arith.constant 0 : i32
    return %c0_i32, %c0_i32_0 : i32, i32
  }
  func.func @transform_4(%arg0: i32) -> (i32, i32) {
    %c0_i32 = arith.constant 0 : i32
    %c0_i32_0 = arith.constant 0 : i32
    %c0_i32_1 = arith.constant 0 : i32
    return %c0_i32, %c0_i32_0 : i32, i32
  }
  func.func @transform_5(%arg0: i32) -> (i32, i32) {
    %c0_i32 = arith.constant 0 : i32
    %c0_i32_0 = arith.constant 0 : i32
    %c0_i32_1 = arith.constant 0 : i32
    return %c0_i32, %c0_i32_0 : i32, i32
  }
  func.func @transform_6(%arg0: i32) -> (i32, i32, i32) {
    %c0_i32 = arith.constant 0 : i32
    %c0_i32_0 = arith.constant 0 : i32
    %c0_i32_1 = arith.constant 0 : i32
    %c0_i32_2 = arith.constant 0 : i32
    return %c0_i32, %c0_i32_0, %c0_i32_1 : i32, i32, i32
  }
  func.func @transform_7(%arg0: i32) -> (i32, i32) {
    %c0_i32 = arith.constant 0 : i32
    %c0_i32_0 = arith.constant 0 : i32
    %c0_i32_1 = arith.constant 0 : i32
    return %c0_i32, %c0_i32_0 : i32, i32
  }
  func.func @transform_8(%arg0: i32) -> (i32, i32) {
    %c0_i32 = arith.constant 0 : i32
    %c0_i32_0 = arith.constant 0 : i32
    return %arg0, %c0_i32 : i32, i32
  }
}

</mosaic_0001>

<bundles_post_ra>
// kernel: tri_modal_forward.1
= control target key start
LH: loop header
LB: loop body
LE: loop exit
PB: predicated region body
PF: predicated region fallthrough
CT: control target
= control target key end

     0   :  { %13 = vsyncpa [#allocation3], 0  ;;  %s887_s27 = smov [#allocation2]   ;;  %s1058_s0 = inlined_call_operand.vmem [shape: bf16[2,8,32], index: 0, kind: input, shape index: {}]   ;;  %s1059_s1 = inlined_call_operand.vmem [shape: bf16[2,48], index: 1, kind: input, shape index: {}]   ;;  %s1060_s2 = inlined_call_operand.vmem [shape: bf16[2,51], index: 2, kind: input, shape index: {}]   ;;  %s1061_s3 = inlined_call_operand.vmem [shape: bf16[32,128], index: 3, kind: input, shape index: {}]   ;;  %s1062_s4 = inlined_call_operand.vmem [shape: bf16[48,128], index: 4, kind: input, shape index: {}]   ;;  %s1063_s5 = inlined_call_operand.vmem [shape: bf16[51,128], index: 5, kind: input, shape index: {}]   ;;  %s1064_s6 = inlined_call_operand.hbm [shape: bf16[3,128,128], index: 6, kind: input, shape index: {}]   ;;  %s1065_s7 = inlined_call_operand.vmem [shape: f32[8,128], index: 7, kind: input, shape index: {}]   ;;  %s1066_s8 = inlined_call_operand.vmem [shape: f32[2,384], index: 8, kind: output, shape index: {}]  }
   0x1   :  { %s31_s28 = sshll.u32 %s887_s27, 4  ;;  %s863_s9 = scalar_lea.hbm %s1064_s6, 3072  ;;  %s32_s28 = int_to_ptr.vmem [resolvable:$true] %s31_s28 }
   0x2   :  { %p864_p0 = scmp.ne.s32.totalorder %s1064_s6, %s863_s9  ;;  %p867_p1 = scmp.lt.u32.totalorder %s863_s9, %s1064_s6 }
   0x4   :  { %p869_p2 = pnand %p867_p1, %p864_p0 }
   0x6   :  { %872 = shalt.err (!%p869_p2)
}
   0x7   :  { %s873_s14 = scalar_lea.vmem %s32_s28, 3072  ;;  %p878_p4 = scmp.lt.s32.totalorder %s32_s28, %s32_s28 }
   0x8   :  { %p874_p3 = scmp.ne.s32.totalorder %s32_s28, %s873_s14  ;;  %p879_p5 = scmp.lt.s32.totalorder %s873_s14, %s873_s14 }
   0xa   :  { %p880_p6 = por %p879_p5, %p878_p4 }
   0xc   :  { %p881_p7 = pnand %p880_p6, %p874_p3 }
   0xe   :  { %884 = shalt.err (!%p881_p7)
}
   0xf   :  { %s888_s15 = smov 64   ;;  %s889_s16 = smov 4  }
  0x10   :  { %37 = dma.hbm_to_vmem [thread:$0]  %s1064_s6, 3072, %s32_s28, [#allocation3], %s888_s15, %s888_s15, %s889_s16  }
  0x11   :  { %885 = dma.done.wait [#allocation3], 3072  }
  0x12   :  { %886 = vsyncadd [#allocation3], 4294964224  ;;  %v890_v0 = vmov 0.0   ;;  %vm891_vm0 = vmmov 0   ;;  %v830_v1 = vld [vmem:[%s1061_s3] sm:$0xff]   ;;  %v831_v2 = vld [vmem:[%s1061_s3 + $0x8] sm:$0xff]   ;;  %v89_v48 = vlaneseq }
  0x13   :  { %733 = vmatprep.subr.bf16.mxu0 %v890_v0  ;;  %737 = vmatprep.mubr.msk.bf16.mxu0 %vm891_vm0, %v890_v0  ;;  %v691_v3 = vld [vmem:[%s1058_s0] sm:$0xff]   ;;  %vm49_vm1 = vcmask 261120   ;;  %v836_v11 = vld [vmem:[#allocation2 + $0x8] sm:$0xff]   ;;  %v837_v16 = vld [vmem:[#allocation2 + $0x10] sm:$0xff]   ;;  %vm97_vm2 = vcmask 1041409   ;;  %vm295_vm3 = vcmask 392192  }
  0x14   :  { %741 = vmatprep.subr.bf16.mxu1 %v890_v0  ;;  %757 = vmatprep.mubr.msk.bf16.mxu1 %vm891_vm0, %v890_v0  ;;  %v692_v4 = vunpack.c.l.bf16 %v691_v3  ;;  %v693_v5 = vunpack.c.h.bf16 %v691_v3  ;;  %v835_v8 = vld [vmem:[#allocation2] sm:$0xff]   ;;  %v839_v21 = vld [vmem:[#allocation2 + $0x18] sm:$0xff]   ;;  %v843_v29 = vld [vmem:[#allocation2 + $0x28] sm:$0xff]   ;;  %v1006_v49 = vshrl.u32 %v89_v48, 7  ;;  %vm487_vm4 = vcmask 1040384  }
  0x15   :  { %734 = vmatpush3.bf16.msra.mxu0 %v830_v1  ;;  %742 = vmatpush3.bf16.msra.mxu1 %v835_v8  ;;  %v841_v24 = vld [vmem:[#allocation2 + $0x20] sm:$0xff]   ;;  %v833_v35 = vld [vmem:[%s1062_s4 + $0x8] sm:$0xff]   ;;  %v834_v36 = vld [vmem:[%s1062_s4 + $0x10] sm:$0xff]   ;;  %vm488_vm5 = vcmask 1041408   ;;  %v892_v8 = vmov 65535   ;;  %vm483_vm6 = vcmask 416768  }
  0x16   :  { %735 = vmatprep.subr.bf16.mxu0 %v890_v0  ;;  %v50_v6 = vsel %vm49_vm1, %v692_v4, 0.0  ;;  %v57_v7 = vsel %vm49_vm1, %v693_v5, 0.0  ;;  %743 = vmatprep.subr.bf16.mxu1 %v890_v0  ;;  %v832_v32 = vld [vmem:[%s1062_s4] sm:$0xff]   ;;  %v840_v39 = vld [vmem:[#allocation2 + $0x48] sm:$0xff]   ;;  %v842_v40 = vld [vmem:[#allocation2 + $0x50] sm:$0xff]   ;;  %v91_v50 = vsub.s32 0, %v1006_v49 }
  0x17   :  { %v51_v9 = vrot.slane %v50_v6, 4  ;;  %v58_v10 = vrot.slane %v57_v7, 4  ;;  %v249_v37 = vld [vmem:[%s1059_s1] sm:$0x1]  ;;  %v844_v41 = vld [vmem:[#allocation2 + $0x58] sm:$0xff]   ;;  %v845_v42 = vld [vmem:[#allocation2 + $0x30] sm:$0xff]  }
  0x18   :  { %v838_v38 = vld [vmem:[#allocation2 + $0x40] sm:$0xff]   ;;  %v847_v44 = vld [vmem:[#allocation2 + $0x38] sm:$0xff]   ;;  %v848_v45 = vld [vmem:[#allocation2 + $0x68] sm:$0xff]   ;;  %v275_v60 = vsub.s32 2, %v1006_v49  ;;  %v538_v48 = vsub.s32 5, %v1006_v49 }
  0x19   :  { %736 = vmatpush3.bf16.msra.mxu0 %v831_v2  ;;  %v52_v12 = vadd.f32 %v51_v9, %v50_v6  ;;  %v59_v13 = vadd.f32 %v58_v10, %v57_v7  ;;  %744 = vmatpush3.bf16.msra.mxu1 %v836_v11  ;;  %v846_v43 = vld [vmem:[#allocation2 + $0x60] sm:$0xff]   ;;  %v849_v46 = vld [vmem:[#allocation2 + $0x70] sm:$0xff]   ;;  %v850_v47 = vld [vmem:[#allocation2 + $0x78] sm:$0xff]   ;;  %v489_v9 = vsel %vm487_vm4, 4294967295, %v892_v8 }
  0x1a   :  { %761 = vmatprep.subr.bf16.mxu0 %v890_v0  ;;  %745 = vmatprep.subr.bf16.mxu1 %v890_v0  ;;  %v1012_v51 = vld [vmem:[%s1065_s7] sm:$0xff]  ;;  %v852_v7 = vld [vmem:[%s1063_s5 + $0x8] sm:$0xff]   ;;  %v853_v10 = vld [vmem:[%s1063_s5 + $0x10] sm:$0xff]  }
  0x1b   :  { %v53_v14 = vrot.slane %v52_v12, 2  ;;  %v60_v15 = vrot.slane %v59_v13, 2  ;;  %v92_v52 = vrot.slane %v1012_v51, %v91_v50  ;;  %v276_v61 = vrot.slane %v1012_v51, %v275_v60  ;;  %v851_v5 = vld [vmem:[%s1063_s5] sm:$0xff]   ;;  %v854_v11 = vld [vmem:[%s1063_s5 + $0x18] ss:$0 sps:$4 sm:$0x33]  }
  0x1d   :  { %v54_v17 = vadd.f32 %v53_v14, %v52_v12  ;;  %v61_v18 = vadd.f32 %v60_v15, %v59_v13  ;;  %746 = vmatpush3.bf16.msra.mxu1 %v837_v16  ;;  %v490_v12 = vsel %vm488_vm5, %v489_v9, 0  ;;  %v433_v14 = vld [vmem:[%s1060_s2] sm:$0x1]  ;;  %v856_v16 = vld [vmem:[#allocation2 + $0x88] sm:$0xff]  }
  0x1e   :  { %747 = vmatprep.subr.bf16.mxu1 %v890_v0  ;;  %v492_v13 = vand.u32 %v854_v11, %v490_v12  ;;  %v855_v15 = vld [vmem:[#allocation2 + $0x80] sm:$0xff]  }
  0x1f   :  { %v55_v19 = vrot.slane %v54_v17, 1  ;;  %v62_v20 = vrot.slane %v61_v18, 1 }
  0x21   :  { %v56_v22 = vadd.f32 %v55_v19, %v54_v17  ;;  %v63_v23 = vadd.f32 %v62_v20, %v61_v18  ;;  %748 = vmatpush3.bf16.msra.mxu1 %v839_v21  ;;  %v857_v17 = vld [vmem:[#allocation2 + $0x90] sm:$0xff]   ;;  %v858_v18 = vld [vmem:[#allocation2 + $0x98] sm:$0xff]   ;;  %v859_v19 = vld [vmem:[#allocation2 + $0xa0] sm:$0xff]  }
  0x22   :  { %749 = vmatprep.subr.bf16.mxu1 %v890_v0  ;;  %v860_v20 = vld [vmem:[#allocation2 + $0xa8] sm:$0xff]   ;;  %v861_v21 = vld [vmem:[#allocation2 + $0xb0] sm:$0xff]  }
  0x23   :  { %v65_v25 = vmul.f32 0.125, %v56_v22  ;;  %v66_v26 = vmul.f32 0.125, %v63_v23  ;;  %v862_v22 = vld [vmem:[#allocation2 + $0xb8] sm:$0xff]  }
  0x25   :  { %v67_v27 = vpack.c.bf16 %v65_v25, %v65_v25  ;;  %v68_v28 = vpack.c.bf16 %v66_v26, %v66_v26  ;;  %750 = vmatpush3.bf16.msra.mxu1 %v841_v24 }
  0x26   :  { %751 = vmatprep.subr.bf16.mxu1 %v890_v0 }
  0x27   :  { %v95_v30 = vunpack.c.l.b16 %v67_v27  ;;  %v96_v31 = vunpack.c.l.b16 %v68_v28  ;;  %v159_v27 = vsub.s32 1, %v1006_v49  ;;  %v343_v28 = vsub.s32 3, %v1006_v49 }
  0x29   :  { %v98_v33 = vsel %vm97_vm2, %v96_v31, %v95_v30  ;;  %752 = vmatpush3.bf16.msra.mxu1 %v843_v29  ;;  %v160_v29 = vrot.slane %v1012_v51, %v159_v27  ;;  %v344_v30 = vrot.slane %v1012_v51, %v343_v28 }
  0x2a   :  { %v99_v34 = vpack.c.b16 %v98_v33, %v98_v33  ;;  %753 = vmatprep.subr.bf16.mxu1 %v890_v0 }
  0x2c   :  { %738 = vmatmul.mubr.msk.bf16.vlgmr.msra.gmra.mrb[0].mxu0 %vm49_vm1, %v99_v34 }
  0x2d   :  { %762 = vmatpush3.bf16.msra.mxu0 %v832_v32  ;;  %767 = vmatprep.mubr.msk.bf16.mxu0 %vm891_vm0, %v890_v0 }
  0x2e   :  { %763 = vmatprep.subr.bf16.mxu0 %v890_v0  ;;  %754 = vmatpush3.bf16.msra.mxu1 %v845_v42 }
  0x2f   :  { %755 = vmatprep.subr.bf16.mxu1 %v890_v0 }
  0x31   :  { %764 = vmatpush3.bf16.msra.mxu0 %v833_v35 }
  0x32   :  { %765 = vmatprep.subr.bf16.mxu0 %v890_v0  ;;  %756 = vmatpush3.bf16.msra.mxu1 %v847_v44 }
  0x33   :  { %803 = vmatprep.subr.bf16.mxu1 %v890_v0 }
  0x35   :  { %766 = vmatpush3.bf16.msra.mxu0 %v834_v36 }
  0x36   :  { %771 = vmatprep.subr.bf16.mxu0 %v890_v0 }
  0x38   :  { %768 = vmatmul.mubr.msk.bf16.vlgmr.msra.gmra.mrb[4].mxu0 %vm295_vm3, %v249_v37  ;;  %v460_v37 = vsub.s32 4, %v1006_v49 }
  0x39   :  { %772 = vmatpush3.bf16.msra.mxu0 %v838_v38  ;;  %787 = vmatprep.mubr.msk.bf16.mxu0 %vm891_vm0, %v890_v0 }
  0x3a   :  { %773 = vmatprep.subr.bf16.mxu0 %v890_v0  ;;  %v461_v38 = vrot.slane %v1012_v51, %v460_v37 }
  0x3d   :  { %774 = vmatpush3.bf16.msra.mxu0 %v840_v39 }
  0x3e   :  { %775 = vmatprep.subr.bf16.mxu0 %v890_v0 }
  0x41   :  { %776 = vmatpush3.bf16.msra.mxu0 %v842_v40 }
  0x42   :  { %777 = vmatprep.subr.bf16.mxu0 %v890_v0 }
  0x45   :  { %778 = vmatpush3.bf16.msra.mxu0 %v844_v41 }
  0x46   :  { %779 = vmatprep.subr.bf16.mxu0 %v890_v0 }
  0x49   :  { %780 = vmatpush3.bf16.msra.mxu0 %v846_v43 }
  0x4a   :  { %781 = vmatprep.subr.bf16.mxu0 %v890_v0 }
  0x4d   :  { %782 = vmatpush3.bf16.msra.mxu0 %v848_v45 }
  0x4e   :  { %783 = vmatprep.subr.bf16.mxu0 %v890_v0 }
  0x51   :  { %784 = vmatpush3.bf16.msra.mxu0 %v849_v46  ;;  %v893_v46 = vmov 1983009808  }
  0x52   :  { %785 = vmatprep.subr.bf16.mxu0 %v890_v0 }
  0x55   :  { %786 = vmatpush3.bf16.msra.mxu0 %v850_v47  ;;  %v633_v47 = vunpack.c.l.s4 %v893_v46 }
  0x56   :  { %791 = vmatprep.subr.bf16.mxu0 %v890_v0 }
  0x57   :  { %v634_v50 = vunpack.c.0.s8 %v633_v47 }
  0xff   :  { %v149_v53 = vpop.f32.mrb[0].mxu0 }
 0x100   :  { %v150_v54 = vadd.f32 %v149_v53, %v92_v52  ;;  %v739_v55 = vpop.f32.mrb[1].mxu0  ;;  %v539_v52 = vrot.slane %v1012_v51, %v538_v48  ;;  %v637_v53 = vsub.s32 %v634_v50, %v1006_v49 }
 0x101   :  { %v152_v56 = vpop.f32.mrb[2].mxu0 }
 0x102   :  { %v155_v57 = vmax.f32 %v150_v54, 0.0  ;;  %v740_v58 = vpop.f32.mrb[3].mxu0 }
 0x104   :  { %v156_v59 = vpack.c.bf16 %v155_v57, %v155_v57 }
 0x106   :  { %758 = vmatmul.mubr.bf16.vlgmr.msra.gmra.mrb[0].mxu1 %v156_v59 }
 0x107   :  { %819 = vmatprep.mubr.msk.bf16.mxu1 %vm891_vm0, %v890_v0  ;;  %804 = vmatpush3.bf16.msra.mxu1 %v855_v15 }
 0x108   :  { %805 = vmatprep.subr.bf16.mxu1 %v890_v0 }
 0x10b   :  { %v333_v62 = vpop.f32.mrb[4].mxu0  ;;  %806 = vmatpush3.bf16.msra.mxu1 %v856_v16 }
 0x10c   :  { %v334_v63 = vadd.f32 %v333_v62, %v276_v61  ;;  %v769_v1 = vpop.f32.mrb[5].mxu0  ;;  %807 = vmatprep.subr.bf16.mxu1 %v890_v0 }
 0x10d   :  { %v336_v2 = vpop.f32.mrb[6].mxu0 }
 0x10e   :  { %v339_v3 = vmax.f32 %v334_v63, 0.0  ;;  %v770_v4 = vpop.f32.mrb[7].mxu0 }
 0x10f   :  { %808 = vmatpush3.bf16.msra.mxu1 %v857_v17 }
 0x110   :  { %v340_v6 = vpack.c.bf16 %v339_v3, %v339_v3  ;;  %809 = vmatprep.subr.bf16.mxu1 %v890_v0 }
 0x112   :  { %788 = vmatmul.mubr.bf16.vlgmr.msra.gmra.mrb[8].mxu0 %v340_v6 }
 0x113   :  { %792 = vmatpush3.bf16.msra.mxu0 %v851_v5  ;;  %799 = vmatprep.mubr.msk.bf16.mxu0 %vm891_vm0, %v890_v0 }
 0x114   :  { %793 = vmatprep.subr.bf16.mxu0 %v890_v0  ;;  %810 = vmatpush3.bf16.msra.mxu1 %v858_v18 }
 0x115   :  { %811 = vmatprep.subr.bf16.mxu1 %v890_v0 }
 0x117   :  { %794 = vmatpush3.bf16.msra.mxu0 %v852_v7 }
 0x118   :  { %795 = vmatprep.subr.bf16.mxu0 %v890_v0  ;;  %812 = vmatpush3.bf16.msra.mxu1 %v859_v19 }
 0x119   :  { %813 = vmatprep.subr.bf16.mxu1 %v890_v0 }
 0x11b   :  { %796 = vmatpush3.bf16.msra.mxu0 %v853_v10 }
 0x11c   :  { %797 = vmatprep.subr.bf16.mxu0 %v890_v0  ;;  %814 = vmatpush3.bf16.msra.mxu1 %v860_v20 }
 0x11d   :  { %815 = vmatprep.subr.bf16.mxu1 %v890_v0 }
 0x11f   :  { %798 = vmatpush3.bf16.msra.mxu0 %v492_v13 }
 0x120   :  { %816 = vmatpush3.bf16.msra.mxu1 %v861_v21 }
 0x121   :  { %817 = vmatprep.subr.bf16.mxu1 %v890_v0 }
 0x122   :  { %800 = vmatmul.mubr.msk.bf16.vlgmr.msra.gmra.mrb[12].mxu0 %vm483_vm6, %v433_v14 }
 0x124   :  { %818 = vmatpush3.bf16.msra.mxu1 %v862_v22 }
 0x1d9   :  { %v243_v23 = vpop.f32.mrb[0].mxu1 }
 0x1da   :  { %v759_v24 = vpop.f32.mrb[1].mxu1  ;;  %v244_v32 = vadd.f32 %v243_v23, %v160_v29 }
 0x1db   :  { %v246_v25 = vpop.f32.mrb[2].mxu1 }
 0x1dc   :  { %v760_v26 = vpop.f32.mrb[3].mxu1 }
 0x1e5   :  { %v427_v31 = vpop.f32.mrb[8].mxu0 }
 0x1e6   :  { %v428_v33 = vadd.f32 %v427_v31, %v344_v30  ;;  %v789_v34 = vpop.f32.mrb[9].mxu0 }
 0x1e7   :  { %v430_v35 = vpop.f32.mrb[10].mxu0 }
 0x1e8   :  { %v631_v0 = vcombine.low %v244_v32, %v428_v33  ;;  %v790_v36 = vpop.f32.mrb[11].mxu0 }
 0x1ea   :  { %v638_v58 = vrot.slane %v631_v0, %v637_v53 }
 0x1f5   :  { %v528_v39 = vpop.f32.mrb[12].mxu0 }
 0x1f6   :  { %v529_v40 = vadd.f32 %v528_v39, %v461_v38  ;;  %v801_v41 = vpop.f32.mrb[13].mxu0 }
 0x1f7   :  { %v531_v42 = vpop.f32.mrb[14].mxu0 }
 0x1f8   :  { %v534_v43 = vmax.f32 %v529_v40, 0.0  ;;  %v802_v44 = vpop.f32.mrb[15].mxu0 }
 0x1fa   :  { %v535_v45 = vpack.c.bf16 %v534_v43, %v534_v43 }
 0x1fc   :  { %820 = vmatmul.mubr.bf16.vlgmr.msra.gmra.mrb[4].mxu1 %v535_v45 }
 0x2cf   :  { %v622_v54 = vpop.f32.mrb[4].mxu1 }
 0x2d0   :  { %v623_v55 = vadd.f32 %v622_v54, %v539_v52  ;;  %v821_v56 = vpop.f32.mrb[5].mxu1 }
 0x2d1   :  { %v625_v57 = vpop.f32.mrb[6].mxu1 }
 0x2d2   :  { %v645_v59 = vrot.slane %v623_v55, %v637_v53  ;;  %v822_v60 = vpop.f32.mrb[7].mxu1 }
 0x2d4   :  { %v646_v61 = vcombine.low %v638_v58, %v645_v59 }
 0x2d6   :  { %648 = vst [vmem:[%s1066_s8] sm:$0x3f] %v646_v61 }
 0x2d7   :  { %653 = vsyncpa [#allocation3], 1 }

</bundles_post_ra>
